<compile_context>
chip_gen: v7x
topology: tpu7x:2x2x1
jax: 0.10.0
libtpu: 0.0.40
codegen_flags: <defaults>
</compile_context>

<pallas_src>
from functools import partial

import jax
import jax.numpy as jnp
from jax import lax
from jax.experimental import pallas as pl
from jax.experimental.pallas import tpu as pltpu
import numpy as np

EPS = 1e-5


def multiblock_kernel(xid_ref, w1_ref, w2_ref, g1_ref, b1_ref, g2_ref, b2_ref,
                      bnred_ref, mtop_ref, mbot_ref, out_ref, *, inv_m):
    """Whole block, single invocation (grid=()).

    xid_ref : (N*H, W*C) f32   lane-dense input (lane = w*C + c); also the residual
    w1_ref  : (3, W*C, W*C) bf16  conv1 weights, one block-banded matrix per dy tap
    w2_ref  : (W*C, W*C) bf16     SAPConv weight: horizontal avg * 1/9 folded into 1x1 conv
    g*/b*   : (1, W*C) f32        BN gamma/beta, already lane-broadcast per channel
    bnred   : (W*C, W*C) f32      per-channel reduce+rebroadcast matrix (kron(ones(W,W), I_C))
    mtop    : (N*H, 1) f32        0.0 on rows with h == 0, else 1.0
    mbot    : (N*H, 1) f32        0.0 on rows with h == H-1, else 1.0
    out_ref : (N*H, W*C) f32      lane-dense output slab
    """
    NH, WC = out_ref.shape

    x = xid_ref[...]
    bnred = bnred_ref[...]
    mtop = mtop_ref[...]
    mbot = mbot_ref[...]

    def bn_scale_shift(v, g_d, b_d):
        # Training-mode batch stats in one pass; reduce + per-lane rebroadcast via one
        # matmul each, so no cross-lane tile/gather is ever needed.
        # NOTE: E[x^2]-mean^2 can cancel for large means; fine at this scale/tolerance.
        s1 = jnp.sum(v, axis=0, keepdims=True)                  # (1, WC)
        s2 = jnp.sum(v * v, axis=0, keepdims=True)              # (1, WC)
        mean_d = jnp.dot(s1, bnred, preferred_element_type=jnp.float32) * inv_m
        ex2_d = jnp.dot(s2, bnred, preferred_element_type=jnp.float32) * inv_m
        var_d = jnp.maximum(ex2_d - mean_d * mean_d, 0.0)
        scale_d = g_d * lax.rsqrt(var_d + EPS)                  # (1, WC)
        shift_d = b_d - mean_d * scale_d                        # (1, WC)
        return scale_d, shift_d

    # ---- conv1: 3 per-dy bf16 MXU matmuls; dx taps + column padding live in the weights.
    x_up = pltpu.roll(x, 1, axis=0) * mtop        # row h-1 (zero at image top edge)
    x_dn = pltpu.roll(x, NH - 1, axis=0) * mbot   # row h+1 (zero at image bottom edge)
    acc = jnp.dot(x_up.astype(jnp.bfloat16), w1_ref[0],
                  preferred_element_type=jnp.float32)
    acc = acc + jnp.dot(x.astype(jnp.bfloat16), w1_ref[1],
                        preferred_element_type=jnp.float32)
    acc = acc + jnp.dot(x_dn.astype(jnp.bfloat16), w1_ref[2],
                        preferred_element_type=jnp.float32)

    # ---- bn1 (batch stats) + relu, all f32 elementwise.
    sc1, sh1 = bn_scale_shift(acc, g1_ref[...], b1_ref[...])
    t = jnp.maximum(acc * sc1 + sh1, 0.0)

    # ---- SAPConv: vertical 3-tap sum (rolls + masks); horizontal taps, the 1/9 and the
    #      1x1 pointwise conv are all folded into w2_ref -> single bf16 matmul.
    t_up = pltpu.roll(t, 1, axis=0) * mtop
    t_dn = pltpu.roll(t, NH - 1, axis=0) * mbot
    vsum = t + t_up + t_dn
    y = jnp.dot(vsum.astype(jnp.bfloat16), w2_ref[...],
                preferred_element_type=jnp.float32)

    # ---- bn2 + residual + relu, lane-dense store.
    sc2, sh2 = bn_scale_shift(y, g2_ref[...], b2_ref[...])
    out_ref[...] = jnp.maximum(y * sc2 + sh2 + x, 0.0)


def multiblock_forward(x_nchw, w1, w2, g1, b1, g2, b2):
    """Wrapper: NCHW -> lane-dense slab, fold shifts into weights, call the kernel."""
    N, C, H, W = x_nchw.shape
    Cout = w1.shape[0]
    assert C == Cout, "residual add requires in_channels == out_channels"
    WC = W * C
    NH = N * H
    assert WC % 128 == 0, "lane-dense layout requires W*C to be a multiple of 128"

    # TODO(synk): accept NHWC directly (or fuse into the producer) to avoid this transpose.
    xid = jnp.transpose(x_nchw, (0, 2, 3, 1)).astype(jnp.float32).reshape(NH, WC)

    # Column-shift selectors: S[w_in, w_out] = 1 iff w_in == w_out + dx_off.
    s_m1 = jnp.eye(W, k=1, dtype=jnp.float32)    # input column w-1
    s_0 = jnp.eye(W, dtype=jnp.float32)          # input column w
    s_p1 = jnp.eye(W, k=-1, dtype=jnp.float32)   # input column w+1
    shifts = (s_m1, s_0, s_p1)

    # conv1 (Cout, Cin, 3, 3): fold the 3 dx taps into one block-banded matrix per dy.
    w1_t = jnp.transpose(w1, (2, 3, 1, 0)).astype(jnp.float32)   # (3, 3, Cin, Cout)
    w1_dy = jnp.stack(
        [jnp.kron(shifts[0], w1_t[dy, 0])
         + jnp.kron(shifts[1], w1_t[dy, 1])
         + jnp.kron(shifts[2], w1_t[dy, 2]) for dy in range(3)],
        axis=0).astype(jnp.bfloat16)                             # (3, W*Cin, W*Cout)

    # SAPConv: fold horizontal 3-tap average (and 1/9) into the 1x1 conv weight.
    w2k = jnp.transpose(w2.reshape(Cout, C)).astype(jnp.float32)  # (Cin, Cout)
    w2eff = jnp.kron((s_m1 + s_0 + s_p1) / 9.0, w2k).astype(jnp.bfloat16)  # (WC, WC)

    # BN helpers: per-channel reduce+rebroadcast matrix, lane-broadcast gamma/beta.
    bnred = jnp.kron(jnp.ones((W, W), jnp.float32), jnp.eye(C, dtype=jnp.float32))
    g1d = jnp.tile(g1.reshape(1, C).astype(jnp.float32), (1, W))
    b1d = jnp.tile(b1.reshape(1, C).astype(jnp.float32), (1, W))
    g2d = jnp.tile(g2.reshape(1, C).astype(jnp.float32), (1, W))
    b2d = jnp.tile(b2.reshape(1, C).astype(jnp.float32), (1, W))

    # Precomputed image top/bottom edge masks (no in-kernel iota / mod).
    h_idx = jnp.arange(NH, dtype=jnp.int32) % H
    mtop = (h_idx != 0).astype(jnp.float32).reshape(NH, 1)
    mbot = (h_idx != H - 1).astype(jnp.float32).reshape(NH, 1)

    vmem = pl.BlockSpec(memory_space=pltpu.MemorySpace.VMEM)
    out = pl.pallas_call(
        partial(multiblock_kernel, inv_m=1.0 / float(N * H * W)),
        out_shape=jax.ShapeDtypeStruct((NH, WC), jnp.float32),
        in_specs=[vmem] * 10,
        out_specs=vmem,
    )(xid, w1_dy, w2eff, g1d, b1d, g2d, b2d, bnred, mtop, mbot)

    return jnp.transpose(out.reshape(N, H, W, C), (0, 3, 1, 2))   # back to NCHW


# ---------------- pure-JAX reference (correctness check) ----------------
def _bn_train(x, g, b):
    mean = jnp.mean(x, axis=(0, 2, 3), keepdims=True)
    var = jnp.mean((x - mean) ** 2, axis=(0, 2, 3), keepdims=True)
    return (x - mean) * lax.rsqrt(var + EPS) * g.reshape(1, -1, 1, 1) + b.reshape(1, -1, 1, 1)


def multiblock_ref(x, w1, w2, g1, b1, g2, b2):
    out = lax.conv_general_dilated(x, w1, (1, 1), ((1, 1), (1, 1)),
                                   dimension_numbers=("NCHW", "OIHW", "NCHW"))
    out = jnp.maximum(_bn_train(out, g1, b1), 0.0)
    pooled = lax.reduce_window(out, 0.0, lax.add, (1, 1, 3, 3), (1, 1, 1, 1),
                               [(0, 0), (0, 0), (1, 1), (1, 1)]) / 9.0
    out = lax.conv_general_dilated(pooled, w2, (1, 1), ((0, 0), (0, 0)),
                                   dimension_numbers=("NCHW", "OIHW", "NCHW"))
    out = _bn_train(out, g2, b2)
    return jnp.maximum(out + x, 0.0)


if __name__ == "__main__":
    # batch=2, channels=8 (in == out for the residual), spatial=16 -> W*C = 128 lanes.
    N, C, H, W = 2, 8, 16, 16
    key = jax.random.PRNGKey(0)
    kx, kw1, kw2 = jax.random.split(key, 3)

    x = jax.random.normal(kx, (N, C, H, W), dtype=jnp.float32)
    w1 = jax.random.normal(kw1, (C, C, 3, 3), dtype=jnp.float32) * 0.1   # conv1 (no bias)
    w2 = jax.random.normal(kw2, (C, C, 1, 1), dtype=jnp.float32) * 0.1   # SAPConv 1x1 (no bias)
    g1 = jnp.ones((C,), jnp.float32)
    b1 = jnp.zeros((C,), jnp.float32)
    g2 = jnp.ones((C,), jnp.float32)
    b2 = jnp.zeros((C,), jnp.float32)

    out = jax.block_until_ready(multiblock_forward(x, w1, w2, g1, b1, g2, b2))
    ref = jax.block_until_ready(multiblock_ref(x, w1, w2, g1, b1, g2, b2))

    # Tolerance reflects bf16 MXU operands in the kernel vs. the all-f32 reference;
    # structural errors would show up as O(1) mismatches, far above this.
    np.testing.assert_allclose(np.asarray(out), np.asarray(ref), rtol=5e-2, atol=5e-2)

    print("KERNEL_OK")
</pallas_src>

<mosaic_0001>
module attributes {stable_mosaic.version = 11 : i64} {
  func.func @multiblock_kernel(%arg0: memref<32x128xf32, #tpu.memory_space<vmem>>, %arg1: memref<3x128x128xbf16, #tpu.memory_space<vmem>>, %arg2: memref<128x128xbf16, #tpu.memory_space<vmem>>, %arg3: memref<1x128xf32, #tpu.memory_space<vmem>>, %arg4: memref<1x128xf32, #tpu.memory_space<vmem>>, %arg5: memref<1x128xf32, #tpu.memory_space<vmem>>, %arg6: memref<1x128xf32, #tpu.memory_space<vmem>>, %arg7: memref<128x128xf32, #tpu.memory_space<vmem>>, %arg8: memref<32x1xf32, #tpu.memory_space<vmem>>, %arg9: memref<32x1xf32, #tpu.memory_space<vmem>>, %arg10: memref<32x128xf32, #tpu.memory_space<vmem>>) attributes {dimension_semantics = [], scalar_prefetch = 0 : i64, scratch_operands = 0 : i64, tpu.core_type = #tpu.core_type<tc>} {
    %c0 = arith.constant 0 : index
    %c0_0 = arith.constant 0 : index
    %0 = vector.load %arg0[%c0, %c0_0] : memref<32x128xf32, #tpu.memory_space<vmem>>, vector<32x128xf32>
    %c0_1 = arith.constant 0 : index
    %c0_2 = arith.constant 0 : index
    %1 = vector.load %arg7[%c0_1, %c0_2] : memref<128x128xf32, #tpu.memory_space<vmem>>, vector<128x128xf32>
    %c0_3 = arith.constant 0 : index
    %c0_4 = arith.constant 0 : index
    %2 = vector.load %arg8[%c0_3, %c0_4] : memref<32x1xf32, #tpu.memory_space<vmem>>, vector<32x1xf32>
    %c0_5 = arith.constant 0 : index
    %c0_6 = arith.constant 0 : index
    %3 = vector.load %arg9[%c0_5, %c0_6] : memref<32x1xf32, #tpu.memory_space<vmem>>, vector<32x1xf32>
    %c1_i32 = arith.constant 1 : i32
    %4 = tpu.dynamic_rotate %0 by %c1_i32 dim 0 : vector<32x128xf32>, i32 -> vector<32x128xf32>
    %5 = vector.broadcast %2 : vector<32x1xf32> to vector<32x128xf32>
    %6 = arith.mulf %4, %5 : vector<32x128xf32>
    %c31_i32 = arith.constant 31 : i32
    %7 = tpu.dynamic_rotate %0 by %c31_i32 dim 0 : vector<32x128xf32>, i32 -> vector<32x128xf32>
    %8 = vector.broadcast %3 : vector<32x1xf32> to vector<32x128xf32>
    %9 = arith.mulf %7, %8 : vector<32x128xf32>
    %10 = arith.truncf %6 : vector<32x128xf32> to vector<32x128xbf16>
    %c0_7 = arith.constant 0 : index
    %c0_8 = arith.constant 0 : index
    %c0_9 = arith.constant 0 : index
    %11 = vector.load %arg1[%c0_7, %c0_8, %c0_9] : memref<3x128x128xbf16, #tpu.memory_space<vmem>>, vector<1x128x128xbf16>
    %12 = vector.shape_cast %11 : vector<1x128x128xbf16> to vector<128x128xbf16>
    %cst = arith.constant dense<0.000000e+00> : vector<32x128xf32>
    %13 = tpu.matmul %10, %12, %cst {dimension_numbers = #tpu.dot_dimension_numbers<[1], [0], [0], [1], [0, 0, 1, 1], [], []>} : vector<32x128xbf16>, vector<128x128xbf16>, vector<32x128xf32> -> vector<32x128xf32>
    %14 = arith.truncf %0 : vector<32x128xf32> to vector<32x128xbf16>
    %c1 = arith.constant 1 : index
    %c0_10 = arith.constant 0 : index
    %c0_11 = arith.constant 0 : index
    %15 = vector.load %arg1[%c1, %c0_10, %c0_11] : memref<3x128x128xbf16, #tpu.memory_space<vmem>>, vector<1x128x128xbf16>
    %16 = vector.shape_cast %15 : vector<1x128x128xbf16> to vector<128x128xbf16>
    %cst_12 = arith.constant dense<0.000000e+00> : vector<32x128xf32>
    %17 = tpu.matmul %14, %16, %cst_12 {dimension_numbers = #tpu.dot_dimension_numbers<[1], [0], [0], [1], [0, 0, 1, 1], [], []>} : vector<32x128xbf16>, vector<128x128xbf16>, vector<32x128xf32> -> vector<32x128xf32>
    %18 = arith.addf %13, %17 : vector<32x128xf32>
    %19 = arith.truncf %9 : vector<32x128xf32> to vector<32x128xbf16>
    %c2 = arith.constant 2 : index
    %c0_13 = arith.constant 0 : index
    %c0_14 = arith.constant 0 : index
    %20 = vector.load %arg1[%c2, %c0_13, %c0_14] : memref<3x128x128xbf16, #tpu.memory_space<vmem>>, vector<1x128x128xbf16>
    %21 = vector.shape_cast %20 : vector<1x128x128xbf16> to vector<128x128xbf16>
    %cst_15 = arith.constant dense<0.000000e+00> : vector<32x128xf32>
    %22 = tpu.matmul %19, %21, %cst_15 {dimension_numbers = #tpu.dot_dimension_numbers<[1], [0], [0], [1], [0, 0, 1, 1], [], []>} : vector<32x128xbf16>, vector<128x128xbf16>, vector<32x128xf32> -> vector<32x128xf32>
    %23 = arith.addf %18, %22 : vector<32x128xf32>
    %c0_16 = arith.constant 0 : index
    %c0_17 = arith.constant 0 : index
    %24 = vector.load %arg3[%c0_16, %c0_17] : memref<1x128xf32, #tpu.memory_space<vmem>>, vector<1x128xf32>
    %c0_18 = arith.constant 0 : index
    %c0_19 = arith.constant 0 : index
    %25 = vector.load %arg4[%c0_18, %c0_19] : memref<1x128xf32, #tpu.memory_space<vmem>>, vector<1x128xf32>
    %cst_20 = arith.constant dense<0.000000e+00> : vector<128xf32>
    %26 = vector.multi_reduction <add>, %23, %cst_20 [0] : vector<32x128xf32> to vector<128xf32>
    %27 = vector.shape_cast %26 : vector<128xf32> to vector<1x128xf32>
    %28 = arith.mulf %23, %23 : vector<32x128xf32>
    %cst_21 = arith.constant dense<0.000000e+00> : vector<128xf32>
    %29 = vector.multi_reduction <add>, %28, %cst_21 [0] : vector<32x128xf32> to vector<128xf32>
    %30 = vector.shape_cast %29 : vector<128xf32> to vector<1x128xf32>
    %cst_22 = arith.constant dense<0.000000e+00> : vector<1x128xf32>
    %31 = tpu.matmul %27, %1, %cst_22 {dimension_numbers = #tpu.dot_dimension_numbers<[1], [0], [0], [1], [0, 0, 1, 1], [], []>} : vector<1x128xf32>, vector<128x128xf32>, vector<1x128xf32> -> vector<1x128xf32>
    %cst_23 = arith.constant 0.001953125 : f32
    %32 = vector.broadcast %cst_23 : f32 to vector<1x128xf32>
    %33 = arith.mulf %31, %32 : vector<1x128xf32>
    %cst_24 = arith.constant dense<0.000000e+00> : vector<1x128xf32>
    %34 = tpu.matmul %30, %1, %cst_24 {dimension_numbers = #tpu.dot_dimension_numbers<[1], [0], [0], [1], [0, 0, 1, 1], [], []>} : vector<1x128xf32>, vector<128x128xf32>, vector<1x128xf32> -> vector<1x128xf32>
    %cst_25 = arith.constant 0.001953125 : f32
    %35 = vector.broadcast %cst_25 : f32 to vector<1x128xf32>
    %36 = arith.mulf %34, %35 : vector<1x128xf32>
    %37 = arith.mulf %33, %33 : vector<1x128xf32>
    %38 = arith.subf %36, %37 : vector<1x128xf32>
    %cst_26 = arith.constant 0.000000e+00 : f32
    %39 = vector.broadcast %cst_26 : f32 to vector<1x128xf32>
    %40 = arith.maximumf %38, %39 : vector<1x128xf32>
    %cst_27 = arith.constant 9.99999974E-6 : f32
    %41 = vector.broadcast %cst_27 : f32 to vector<1x128xf32>
    %42 = arith.addf %40, %41 : vector<1x128xf32>
    %43 = math.rsqrt %42 : vector<1x128xf32>
    %44 = arith.mulf %24, %43 : vector<1x128xf32>
    %45 = arith.mulf %33, %44 : vector<1x128xf32>
    %46 = arith.subf %25, %45 : vector<1x128xf32>
    %47 = vector.broadcast %44 : vector<1x128xf32> to vector<32x128xf32>
    %48 = arith.mulf %23, %47 : vector<32x128xf32>
    %49 = vector.broadcast %46 : vector<1x128xf32> to vector<32x128xf32>
    %50 = arith.addf %48, %49 : vector<32x128xf32>
    %cst_28 = arith.constant 0.000000e+00 : f32
    %51 = vector.broadcast %cst_28 : f32 to vector<32x128xf32>
    %52 = arith.maximumf %50, %51 : vector<32x128xf32>
    %c1_i32_29 = arith.constant 1 : i32
    %53 = tpu.dynamic_rotate %52 by %c1_i32_29 dim 0 : vector<32x128xf32>, i32 -> vector<32x128xf32>
    %54 = vector.broadcast %2 : vector<32x1xf32> to vector<32x128xf32>
    %55 = arith.mulf %53, %54 : vector<32x128xf32>
    %c31_i32_30 = arith.constant 31 : i32
    %56 = tpu.dynamic_rotate %52 by %c31_i32_30 dim 0 : vector<32x128xf32>, i32 -> vector<32x128xf32>
    %57 = vector.broadcast %3 : vector<32x1xf32> to vector<32x128xf32>
    %58 = arith.mulf %56, %57 : vector<32x128xf32>
    %59 = arith.addf %52, %55 : vector<32x128xf32>
    %60 = arith.addf %59, %58 : vector<32x128xf32>
    %61 = arith.truncf %60 : vector<32x128xf32> to vector<32x128xbf16>
    %c0_31 = arith.constant 0 : index
    %c0_32 = arith.constant 0 : index
    %62 = vector.load %arg2[%c0_31, %c0_32] : memref<128x128xbf16, #tpu.memory_space<vmem>>, vector<128x128xbf16>
    %cst_33 = arith.constant dense<0.000000e+00> : vector<32x128xf32>
    %63 = tpu.matmul %61, %62, %cst_33 {dimension_numbers = #tpu.dot_dimension_numbers<[1], [0], [0], [1], [0, 0, 1, 1], [], []>} : vector<32x128xbf16>, vector<128x128xbf16>, vector<32x128xf32> -> vector<32x128xf32>
    %c0_34 = arith.constant 0 : index
    %c0_35 = arith.constant 0 : index
    %64 = vector.load %arg5[%c0_34, %c0_35] : memref<1x128xf32, #tpu.memory_space<vmem>>, vector<1x128xf32>
    %c0_36 = arith.constant 0 : index
    %c0_37 = arith.constant 0 : index
    %65 = vector.load %arg6[%c0_36, %c0_37] : memref<1x128xf32, #tpu.memory_space<vmem>>, vector<1x128xf32>
    %cst_38 = arith.constant dense<0.000000e+00> : vector<128xf32>
    %66 = vector.multi_reduction <add>, %63, %cst_38 [0] : vector<32x128xf32> to vector<128xf32>
    %67 = vector.shape_cast %66 : vector<128xf32> to vector<1x128xf32>
    %68 = arith.mulf %63, %63 : vector<32x128xf32>
    %cst_39 = arith.constant dense<0.000000e+00> : vector<128xf32>
    %69 = vector.multi_reduction <add>, %68, %cst_39 [0] : vector<32x128xf32> to vector<128xf32>
    %70 = vector.shape_cast %69 : vector<128xf32> to vector<1x128xf32>
    %cst_40 = arith.constant dense<0.000000e+00> : vector<1x128xf32>
    %71 = tpu.matmul %67, %1, %cst_40 {dimension_numbers = #tpu.dot_dimension_numbers<[1], [0], [0], [1], [0, 0, 1, 1], [], []>} : vector<1x128xf32>, vector<128x128xf32>, vector<1x128xf32> -> vector<1x128xf32>
    %cst_41 = arith.constant 0.001953125 : f32
    %72 = vector.broadcast %cst_41 : f32 to vector<1x128xf32>
    %73 = arith.mulf %71, %72 : vector<1x128xf32>
    %cst_42 = arith.constant dense<0.000000e+00> : vector<1x128xf32>
    %74 = tpu.matmul %70, %1, %cst_42 {dimension_numbers = #tpu.dot_dimension_numbers<[1], [0], [0], [1], [0, 0, 1, 1], [], []>} : vector<1x128xf32>, vector<128x128xf32>, vector<1x128xf32> -> vector<1x128xf32>
    %cst_43 = arith.constant 0.001953125 : f32
    %75 = vector.broadcast %cst_43 : f32 to vector<1x128xf32>
    %76 = arith.mulf %74, %75 : vector<1x128xf32>
    %77 = arith.mulf %73, %73 : vector<1x128xf32>
    %78 = arith.subf %76, %77 : vector<1x128xf32>
    %cst_44 = arith.constant 0.000000e+00 : f32
    %79 = vector.broadcast %cst_44 : f32 to vector<1x128xf32>
    %80 = arith.maximumf %78, %79 : vector<1x128xf32>
    %cst_45 = arith.constant 9.99999974E-6 : f32
    %81 = vector.broadcast %cst_45 : f32 to vector<1x128xf32>
    %82 = arith.addf %80, %81 : vector<1x128xf32>
    %83 = math.rsqrt %82 : vector<1x128xf32>
    %84 = arith.mulf %64, %83 : vector<1x128xf32>
    %85 = arith.mulf %73, %84 : vector<1x128xf32>
    %86 = arith.subf %65, %85 : vector<1x128xf32>
    %87 = vector.broadcast %84 : vector<1x128xf32> to vector<32x128xf32>
    %88 = arith.mulf %63, %87 : vector<32x128xf32>
    %89 = vector.broadcast %86 : vector<1x128xf32> to vector<32x128xf32>
    %90 = arith.addf %88, %89 : vector<32x128xf32>
    %91 = arith.addf %90, %0 : vector<32x128xf32>
    %cst_46 = arith.constant 0.000000e+00 : f32
    %92 = vector.broadcast %cst_46 : f32 to vector<32x128xf32>
    %93 = arith.maximumf %91, %92 : vector<32x128xf32>
    %c0_47 = arith.constant 0 : index
    %c0_48 = arith.constant 0 : index
    %94 = vector.load %arg10[%c0_47, %c0_48] : memref<32x128xf32, #tpu.memory_space<vmem>>, vector<32x128xf32>
    tpu.vector_store %arg10[%c0_47, %c0_48], %93 {strides = array<i32>} : memref<32x128xf32, #tpu.memory_space<vmem>>, vector<32x128xf32>,
    return
  }
}

</mosaic_0001>

<bundles_post_ra>
// kernel: tpu_custom_call.1
= control target key start
LH: loop header
LB: loop body
LE: loop exit
PB: predicated region body
PF: predicated region fallthrough
CT: control target
= control target key end

     0   :  { %15 = vsyncpa [#allocation3], 0  ;;  %s2097_s0 = inlined_call_operand.hbm [shape: f32[32,128], index: 0, kind: input, shape index: {}]   ;;  %s2098_s1 = inlined_call_operand.hbm [shape: bf16[3,128,128], index: 1, kind: input, shape index: {}]   ;;  %s2099_s2 = inlined_call_operand.vmem [shape: bf16[128,128], index: 2, kind: input, shape index: {}]   ;;  %s2100_s3 = inlined_call_operand.vmem [shape: f32[1,128], index: 3, kind: input, shape index: {}]   ;;  %s2101_s4 = inlined_call_operand.vmem [shape: f32[1,128], index: 4, kind: input, shape index: {}]   ;;  %s2102_s5 = inlined_call_operand.vmem [shape: f32[1,128], index: 5, kind: input, shape index: {}]   ;;  %s2103_s6 = inlined_call_operand.vmem [shape: f32[1,128], index: 6, kind: input, shape index: {}]   ;;  %s2104_s7 = inlined_call_operand.hbm [shape: f32[128,128], index: 7, kind: input, shape index: {}]   ;;  %s2105_s8 = inlined_call_operand.vmem [shape: f32[32,1], index: 8, kind: input, shape index: {}]   ;;  %s2106_s9 = inlined_call_operand.vmem [shape: f32[32,1], index: 9, kind: input, shape index: {}]   ;;  %s2107_s10 = inlined_call_operand.hbm [shape: f32[32,128], index: 10, kind: output, shape index: {}]  }
   0x1   :  { %16 = vsyncpa [#allocation6], 0 }
   0x2   :  { %17 = vsyncpa [#allocation4], 0  ;;  %s1702_s13 = smov [#allocation5]   ;;  %s1608_s17 = scalar_lea.hbm %s2098_s1, 3072 }
   0x3   :  { %s35_s14 = sshll.u32 %s1702_s13, 4  ;;  %p1609_p0 = scmp.ne.s32.totalorder %s2098_s1, %s1608_s17  ;;  %s36_s14 = int_to_ptr.vmem [resolvable:$true] %s35_s14 }
   0x4   :  { %p1612_p1 = scmp.lt.u32.totalorder %s1608_s17, %s2098_s1 }
   0x6   :  { %p1614_p2 = pnand %p1612_p1, %p1609_p0 }
   0x8   :  { %1617 = shalt.err (!%p1614_p2)
}
   0x9   :  { %s1618_s22 = scalar_lea.vmem %s36_s14, 3072  ;;  %p1623_p4 = scmp.lt.s32.totalorder %s36_s14, %s36_s14 }
   0xa   :  { %p1619_p3 = scmp.ne.s32.totalorder %s36_s14, %s1618_s22  ;;  %p1624_p5 = scmp.lt.s32.totalorder %s1618_s22, %s1618_s22 }
   0xc   :  { %p1625_p6 = por %p1624_p5, %p1623_p4 }
   0xe   :  { %p1626_p7 = pnand %p1625_p6, %p1619_p3 }
  0x10   :  { %1629 = shalt.err (!%p1626_p7)
}
  0x11   :  { %s1703_s23 = smov 64   ;;  %s1704_s24 = smov 4  }
  0x12   :  { %41 = dma.hbm_to_vmem [thread:$0]  %s2098_s1, 3072, %s36_s14, [#allocation6], %s1703_s23, %s1703_s23, %s1704_s24  }
  0x13   :  { %s1705_s27 = smov [#allocation2]   ;;  %s1630_s11 = scalar_lea.hbm %s2097_s0, 512 }
  0x14   :  { %s23_s28 = sshll.u32 %s1705_s27, 4  ;;  %p1631_p8 = scmp.ne.s32.totalorder %s2097_s0, %s1630_s11  ;;  %s24_s28 = int_to_ptr.vmem [resolvable:$true] %s23_s28 }
  0x15   :  { %p1634_p9 = scmp.lt.u32.totalorder %s1630_s11, %s2097_s0 }
  0x17   :  { %p1636_p10 = pnand %p1634_p9, %p1631_p8 }
  0x19   :  { %1639 = shalt.err (!%p1636_p10)
}
  0x1a   :  { %s1640_s17 = scalar_lea.vmem %s24_s28, 512  ;;  %p1645_p12 = scmp.lt.s32.totalorder %s24_s28, %s24_s28 }
  0x1b   :  { %p1641_p11 = scmp.ne.s32.totalorder %s24_s28, %s1640_s17  ;;  %p1646_p13 = scmp.lt.s32.totalorder %s1640_s17, %s1640_s17 }
  0x1d   :  { %p1647_p0 = por %p1646_p13, %p1645_p12 }
  0x1f   :  { %p1648_p1 = pnand %p1647_p0, %p1641_p11 }
  0x21   :  { %1651 = shalt.err (!%p1648_p1)
}
  0x22   :  { %s1706_s1 = smov 128   ;;  %s1707_s14 = smov 8  }
  0x23   :  { %29 = dma.hbm_to_vmem [thread:$0]  %s2097_s0, 512, %s24_s28, [#allocation3], %s1706_s1, %s1706_s1, %s1707_s14  }
  0x24   :  { %s1708_s20 = smov [#allocation7]   ;;  %s1652_s24 = scalar_lea.hbm %s2104_s7, 2048 }
  0x25   :  { %s57_s21 = sshll.u32 %s1708_s20, 4  ;;  %p1653_p2 = scmp.ne.s32.totalorder %s2104_s7, %s1652_s24  ;;  %s58_s21 = int_to_ptr.vmem [resolvable:$true] %s57_s21 }
  0x26   :  { %p1656_p3 = scmp.lt.u32.totalorder %s1652_s24, %s2104_s7 }
  0x28   :  { %p1658_p4 = pnand %p1656_p3, %p1653_p2 }
  0x2a   :  { %1661 = shalt.err (!%p1658_p4)
}
  0x2b   :  { %s1662_s30 = scalar_lea.vmem %s58_s21, 2048  ;;  %p1667_p6 = scmp.lt.s32.totalorder %s58_s21, %s58_s21 }
  0x2c   :  { %p1663_p5 = scmp.ne.s32.totalorder %s58_s21, %s1662_s30  ;;  %p1668_p7 = scmp.lt.s32.totalorder %s1662_s30, %s1662_s30 }
  0x2e   :  { %p1669_p8 = por %p1668_p7, %p1667_p6 }
  0x30   :  { %p1670_p9 = pnand %p1669_p8, %p1663_p5 }
  0x32   :  { %1673 = shalt.err (!%p1670_p9)
}
  0x33   :  { %63 = dma.hbm_to_vmem [thread:$0]  %s2104_s7, 2048, %s58_s21, [#allocation6], %s1706_s1, %s1706_s1, %s1707_s14  }
  0x34   :  { %1696 = dma.done.wait [#allocation3], 512  }
  0x35   :  { %1697 = vsyncadd [#allocation3], 4294966784 }
  0x36   :  { %1698 = dma.done.wait [#allocation6], 5120  }
  0x37   :  { %1699 = vsyncadd [#allocation6], 4294962176  ;;  %v1709_v0 = vmov 0   ;;  %v100_v1 = vld [vmem:[%s2105_s8 + $0x10] sm:$0xff]  ;;  %v98_v2 = vld [vmem:[%s2105_s8] sm:$0xff]  ;;  %v1710_v29 = vmov 0.0|0.0   ;;  %v110_v42 = vlaneseq }
  0x38   :  { %1571 = vset.pattern.permute.xlu1 %v1709_v0  ;;  %1570 = vset.pattern.permute.xlu0 %v1709_v0  ;;  %v101_v3 = vld [vmem:[%s2105_s8 + $0x18] sm:$0xff]  ;;  %v99_v4 = vld [vmem:[%s2105_s8 + $0x8] sm:$0xff]  ;;  %v1572_v5 = vld [vmem:[#allocation5 + $0x40] sm:$0xff]   ;;  %vm1711_vm2 = vmmov 0  }
  0x39   :  { %129 = vperm.xlu1 %1571, %v100_v1   ;;  %119 = vperm.xlu0 %1570, %v98_v2   ;;  %v1573_v6 = vld [vmem:[#allocation5 + $0x48] sm:$0xff]   ;;  %v102_v8 = vld [vmem:[%s2106_s9] sm:$0xff]  ;;  %v1574_v9 = vld [vmem:[#allocation5 + $0x50] sm:$0xff]   ;;  %v1860_v43 = vshrl.u32 %v110_v42, 7 }
  0x3a   :  { %v103_v7 = vld [vmem:[%s2106_s9 + $0x8] sm:$0xff]  ;;  %1234 = vmatprep.subr.bf16.mxu0 %v1572_v5  ;;  %v105_v10 = vld [vmem:[%s2106_s9 + $0x18] sm:$0xff]  ;;  %v104_v11 = vld [vmem:[%s2106_s9 + $0x10] sm:$0xff]  ;;  %1454 = vmatprep.subr.bf16.mxu1 %v1710_v29 }
  0x3b   :  { %1235 = vmatpush3.bf16.msra.mxu0 %v1572_v5  ;;  %v1835_v12 = vld [vmem:[#allocation2] sm:$0xff]  ;;  %v1837_v13 = vld [vmem:[#allocation2 + $0x8] sm:$0xff]  ;;  %v1575_v14 = vld [vmem:[#allocation5 + $0x58] sm:$0xff]   ;;  %vm112_vm0 = vcmp.lt.s32.totalorder %v1860_v43, 1  ;;  %vm145_vm1 = vcmp.lt.s32.totalorder %v1860_v43, 7 }
  0x3c   :  { %1236 = vmatprep.subr.bf16.mxu0 %v1573_v6  ;;  %v192_v15 = vpack.c.bf16 %v1837_v13, %v1835_v12  ;;  %v1576_v16 = vld [vmem:[#allocation5 + $0x60] sm:$0xff]   ;;  %v1577_v17 = vld [vmem:[#allocation5 + $0x68] sm:$0xff]   ;;  %v1578_v18 = vld [vmem:[#allocation5 + $0x70] sm:$0xff]   ;;  %v107_v44 = vrot.slane %v1837_v13, 7  ;;  %v106_v46 = vrot.slane %v1835_v12, 7  ;;  %v142_v51 = vrot.slane %v1837_v13, 1 }
  0x3d   :  { %134 = vperm.xlu1 %1571, %v101_v3   ;;  %124 = vperm.xlu0 %1570, %v99_v4   ;;  %v1579_v19 = vld [vmem:[#allocation5 + $0x78] sm:$0xff]   ;;  %v1841_v20 = vld [vmem:[#allocation2 + $0x10] sm:$0xff]  ;;  %v1580_v21 = vld [vmem:[#allocation5] sm:$0xff]   ;;  %v141_v52 = vrot.slane %v1835_v12, 1 }
  0x3e   :  { %1250 = vmatprep.mubr.bf16.mxu0 %v192_v15  ;;  %v1843_v22 = vld [vmem:[#allocation2 + $0x18] sm:$0xff]  ;;  %v1581_v24 = vld [vmem:[#allocation5 + $0x8] sm:$0xff]   ;;  %v1582_v25 = vld [vmem:[#allocation5 + $0x10] sm:$0xff]   ;;  %v108_v45 = vrot.slane %v1841_v20, 7  ;;  %v115_v50 = vsel %vm112_vm0, %v106_v46, %v107_v44  ;;  %v143_v56 = vrot.slane %v1841_v20, 1 }
  0x3f   :  { %1237 = vmatpush3.bf16.msra.mxu0 %v1573_v6  ;;  %v193_v23 = vpack.c.bf16 %v1843_v22, %v1841_v20  ;;  %v82_v26 = vld [vmem:[#allocation7] sm:$0xff]  ;;  %v83_v27 = vld [vmem:[#allocation7 + $0x8] sm:$0xff]  ;;  %v84_v28 = vld [vmem:[#allocation7 + $0x10] sm:$0xff]  ;;  %v109_v47 = vrot.slane %v1843_v22, 7  ;;  %v148_v0 = vsel %vm145_vm1, %v141_v52, %v142_v51 }
  0x40   :  { %1238 = vmatprep.subr.bf16.mxu0 %v1574_v9  ;;  %v1848_v30 = vpack.c.bf16 %v83_v27, %v82_v26  ;;  %v85_v31 = vld [vmem:[#allocation7 + $0x18] sm:$0xff]  ;;  %v86_v34 = vld [vmem:[#allocation7 + $0x20] sm:$0xff]  ;;  %v87_v35 = vld [vmem:[#allocation7 + $0x28] sm:$0xff]  ;;  %v114_v53 = vsel %vm112_vm0, %v107_v44, %v108_v45  ;;  %v147_v63 = vsel %vm145_vm1, %v142_v51, %v143_v56 }
  0x41   :  { %157 = vperm.xlu1 %1571, %v103_v7   ;;  %152 = vperm.xlu0 %1570, %v102_v8   ;;  %v1583_v32 = vld [vmem:[#allocation5 + $0x18] sm:$0xff]   ;;  %v1851_v33 = vpack.c.bf16 %v85_v31, %v84_v28  ;;  %v1584_v36 = vld [vmem:[#allocation5 + $0x20] sm:$0xff]   ;;  %v1855_v37 = vpack.c.bf16 %v87_v35, %v86_v34  ;;  %v1585_v38 = vld [vmem:[#allocation5 + $0x28] sm:$0xff]   ;;  %v116_v54 = vsel %vm112_vm0, %v109_v47, %v106_v46  ;;  %v1712_v46 = vmov 0.0  }
  0x42   :  { %1456 = vmatpush3.bf16.msra.mxu1 %v1848_v30  ;;  %v1586_v39 = vld [vmem:[#allocation5 + $0x30] sm:$0xff]   ;;  %v1587_v40 = vld [vmem:[#allocation5 + $0x38] sm:$0xff]   ;;  %v1588_v41 = vld [vmem:[#allocation5 + $0x80] sm:$0xff]   ;;  %v113_v55 = vsel %vm112_vm0, %v108_v45, %v109_v47  ;;  %1326 = vmatprep.mubr.msk.f32.mxu1 %vm1711_vm2, %v1712_v46 }
  0x43   :  { %1239 = vmatpush3.bf16.msra.mxu0 %v1574_v9  ;;  %1457 = vmatprep.subr.bf16.mxu1 %v1710_v29  ;;  %v1589_v5 = vld [vmem:[#allocation5 + $0x88] sm:$0xff]   ;;  %v1590_v9 = vld [vmem:[#allocation5 + $0x90] sm:$0xff]   ;;  %v89_v28 = vld [vmem:[#allocation7 + $0x38] sm:$0xff] }
  0x44   :  { %1240 = vmatprep.subr.bf16.mxu0 %v1575_v14  ;;  %v1594_v15 = vld [vmem:[#allocation5 + $0xb0] sm:$0xff]   ;;  %v91_v34 = vld [vmem:[#allocation7 + $0x48] sm:$0xff]  ;;  %v97_v45 = vld [vmem:[#allocation7 + $0x78] sm:$0xff] }
  0x45   :  { %167 = vperm.xlu1 %1571, %v105_v10   ;;  %162 = vperm.xlu0 %1570, %v104_v11   ;;  %v1591_v10 = vld [vmem:[#allocation5 + $0x98] sm:$0xff]   ;;  %v1592_v11 = vld [vmem:[#allocation5 + $0xa0] sm:$0xff]   ;;  %v88_v27 = vld [vmem:[#allocation7 + $0x30] sm:$0xff] }
  0x46   :  { %1459 = vmatpush3.bf16.msra.mxu1 %v1851_v33  ;;  %v1919_v31 = vpack.c.bf16 %v89_v28, %v88_v27  ;;  %v96_v44 = vld [vmem:[#allocation7 + $0x70] sm:$0xff]  ;;  %v1601_v27 = vld [vmem:[%s2099_s2 + $0x28] sm:$0xff]  }
  0x47   :  { %1241 = vmatpush3.bf16.msra.mxu0 %v1575_v14  ;;  %1460 = vmatprep.subr.bf16.mxu1 %v1710_v29  ;;  %v1593_v14 = vld [vmem:[#allocation5 + $0xa8] sm:$0xff]   ;;  %v1944_v47 = vpack.c.bf16 %v97_v45, %v96_v44  ;;  %v1602_v28 = vld [vmem:[%s2099_s2 + $0x30] sm:$0xff]  }
  0x48   :  { %1242 = vmatprep.subr.bf16.mxu0 %v1576_v16 }
  0x4a   :  { %1462 = vmatpush3.bf16.msra.mxu1 %v1855_v37 }
  0x4b   :  { %1243 = vmatpush3.bf16.msra.mxu0 %v1576_v16  ;;  %1463 = vmatprep.subr.bf16.mxu1 %v1710_v29  ;;  %v144_v16 = vrot.slane %v1843_v22, 1 }
  0x4c   :  { %1244 = vmatprep.subr.bf16.mxu0 %v1577_v17 }
  0x4e   :  { %1465 = vmatpush3.bf16.msra.mxu1 %v1919_v31 }
  0x4f   :  { %1245 = vmatpush3.bf16.msra.mxu0 %v1577_v17  ;;  %v1595_v17 = vld [vmem:[#allocation5 + $0xb8] sm:$0xff]   ;;  %1466 = vmatprep.subr.bf16.mxu1 %v1710_v29 }
  0x50   :  { %1246 = vmatprep.subr.bf16.mxu0 %v1578_v18 }
  0x53   :  { %1247 = vmatpush3.bf16.msra.mxu0 %v1578_v18 }
  0x54   :  { %1248 = vmatprep.subr.bf16.mxu0 %v1579_v19 }
  0x57   :  { %1249 = vmatpush3.bf16.msra.mxu0 %v1579_v19  ;;  %v149_v19 = vsel %vm145_vm1, %v144_v16, %v141_v52 }
  0x58   :  { %1254 = vmatprep.subr.bf16.mxu0 %v1580_v21 }
  0x5a   :  { %1251 = vmatmul.mubr.bf16.vlgmr.msra.gmra.mrb[0].mxu0 %v193_v23  ;;  %v146_v23 = vsel %vm145_vm1, %v143_v56, %v144_v16 }
  0x5b   :  { %1255 = vmatpush3.bf16.msra.mxu0 %v1580_v21 }
  0x5c   :  { %1256 = vmatprep.subr.bf16.mxu0 %v1581_v24 }
  0x5f   :  { %1257 = vmatpush3.bf16.msra.mxu0 %v1581_v24 }
  0x60   :  { %1258 = vmatprep.subr.bf16.mxu0 %v1582_v25 }
  0x63   :  { %1259 = vmatpush3.bf16.msra.mxu0 %v1582_v25 }
  0x64   :  { %1260 = vmatprep.subr.bf16.mxu0 %v1583_v32 }
  0x67   :  { %1261 = vmatpush3.bf16.msra.mxu0 %v1583_v32  ;;  %v90_v32 = vld [vmem:[#allocation7 + $0x40] sm:$0xff] }
  0x68   :  { %1262 = vmatprep.subr.bf16.mxu0 %v1584_v36  ;;  %v1925_v35 = vpack.c.bf16 %v91_v34, %v90_v32  ;;  %v1603_v32 = vld [vmem:[%s2099_s2 + $0x38] sm:$0xff]  }
  0x6a   :  { %1468 = vmatpush3.bf16.msra.mxu1 %v1925_v35 }
  0x6b   :  { %1263 = vmatpush3.bf16.msra.mxu0 %v1584_v36  ;;  %1469 = vmatprep.subr.bf16.mxu1 %v1710_v29  ;;  %v92_v36 = vld [vmem:[#allocation7 + $0x50] sm:$0xff] }
  0x6c   :  { %1264 = vmatprep.subr.bf16.mxu0 %v1585_v38 }
  0x6f   :  { %1265 = vmatpush3.bf16.msra.mxu0 %v1585_v38  ;;  %v93_v38 = vld [vmem:[#allocation7 + $0x58] sm:$0xff] }
  0x70   :  { %1266 = vmatprep.subr.bf16.mxu0 %v1586_v39 }
  0x73   :  { %1267 = vmatpush3.bf16.msra.mxu0 %v1586_v39  ;;  %v1931_v39 = vpack.c.bf16 %v93_v38, %v92_v36 }
  0x74   :  { %1268 = vmatprep.subr.bf16.mxu0 %v1587_v40 }
  0x75   :  { %1471 = vmatpush3.bf16.msra.mxu1 %v1931_v39 }
  0x76   :  { %1472 = vmatprep.subr.bf16.mxu1 %v1710_v29 }
  0x77   :  { %1269 = vmatpush3.bf16.msra.mxu0 %v1587_v40  ;;  %v94_v40 = vld [vmem:[#allocation7 + $0x60] sm:$0xff] }
  0x78   :  { %1274 = vmatprep.subr.bf16.mxu0 %v1588_v41 }
  0xb8   :  { %v1867_v48 = vpop.permute.xlu1 %129  ;;  %v1869_v49 = vpop.permute.xlu0 %119 }
  0xb9   :  { %v139_v59 = vmul.f32 %v1867_v48, %v114_v53  ;;  %v137_v60 = vmul.f32 %v1869_v49, %v116_v54 }
  0xbc   :  { %v1883_v57 = vpop.permute.xlu1 %134  ;;  %v1885_v58 = vpop.permute.xlu0 %124 }
  0xbd   :  { %v140_v61 = vmul.f32 %v1883_v57, %v113_v55  ;;  %v138_v62 = vmul.f32 %v1885_v58, %v115_v50 }
  0xbf   :  { %v175_v1 = vpack.c.bf16 %v140_v61, %v139_v59  ;;  %v174_v2 = vpack.c.bf16 %v138_v62, %v137_v60 }
  0xc0   :  { %v1895_v3 = vpop.permute.xlu1 %157  ;;  %v1897_v4 = vpop.permute.xlu0 %152 }
  0xc1   :  { %v171_v6 = vmul.f32 %v1895_v3, %v147_v63  ;;  %v170_v7 = vmul.f32 %v1897_v4, %v148_v0  ;;  %1270 = vmatprep.mubr.bf16.mxu0 %v174_v2 }
  0xc2   :  { %1271 = vmatmul.mubr.bf16.vlgmr.msra.gmra.mrb[0].mxu0 %v175_v1 }
  0xc3   :  { %v405_v8 = vpack.c.bf16 %v171_v6, %v170_v7  ;;  %1275 = vmatpush3.bf16.msra.mxu0 %v1588_v41  ;;  %v95_v41 = vld [vmem:[#allocation7 + $0x68] sm:$0xff] }
  0xc4   :  { %1276 = vmatprep.subr.bf16.mxu0 %v1589_v5  ;;  %v1902_v18 = vpop.permute.xlu1 %167  ;;  %v1906_v21 = vpop.permute.xlu0 %162  ;;  %v1937_v42 = vpack.c.bf16 %v95_v41, %v94_v40 }
  0xc5   :  { %1290 = vmatprep.mubr.bf16.mxu0 %v405_v8  ;;  %v173_v24 = vmul.f32 %v1902_v18, %v149_v19  ;;  %v172_v25 = vmul.f32 %v1906_v21, %v146_v23  ;;  %v1596_v19 = vld [vmem:[%s2099_s2] sm:$0xff]   ;;  %v1597_v23 = vld [vmem:[%s2099_s2 + $0x8] sm:$0xff]  }
  0xc6   :  { %1474 = vmatpush3.bf16.msra.mxu1 %v1937_v42 }
  0xc7   :  { %1277 = vmatpush3.bf16.msra.mxu0 %v1589_v5  ;;  %v406_v26 = vpack.c.bf16 %v173_v24, %v172_v25  ;;  %1475 = vmatprep.subr.bf16.mxu1 %v1710_v29  ;;  %v1598_v24 = vld [vmem:[%s2099_s2 + $0x10] sm:$0xff]   ;;  %v1599_v25 = vld [vmem:[%s2099_s2 + $0x18] sm:$0xff]  }
  0xc8   :  { %1278 = vmatprep.subr.bf16.mxu0 %v1590_v9 }
  0xca   :  { %1477 = vmatpush3.bf16.msra.mxu1 %v1944_v47 }
  0xcb   :  { %1279 = vmatpush3.bf16.msra.mxu0 %v1590_v9  ;;  %1478 = vmatprep.subr.bf16.mxu1 %v1710_v29 }
  0xcc   :  { %1280 = vmatprep.subr.bf16.mxu0 %v1591_v10 }
  0xcf   :  { %1281 = vmatpush3.bf16.msra.mxu0 %v1591_v10 }
  0xd0   :  { %1282 = vmatprep.subr.bf16.mxu0 %v1592_v11 }
  0xd3   :  { %1283 = vmatpush3.bf16.msra.mxu0 %v1592_v11 }
  0xd4   :  { %1284 = vmatprep.subr.bf16.mxu0 %v1593_v14 }
  0xd7   :  { %1285 = vmatpush3.bf16.msra.mxu0 %v1593_v14 }
  0xd8   :  { %1286 = vmatprep.subr.bf16.mxu0 %v1594_v15 }
  0xdb   :  { %1287 = vmatpush3.bf16.msra.mxu0 %v1594_v15 }
  0xdc   :  { %1288 = vmatprep.subr.bf16.mxu0 %v1595_v17 }
  0xdf   :  { %1289 = vmatpush3.bf16.msra.mxu0 %v1595_v17 }
  0xe0   :  { %1502 = vmatprep.subr.bf16.mxu0 %v1710_v29 }
  0xe2   :  { %1291 = vmatmul.mubr.bf16.vlgmr.msra.gmra.mrb[0].mxu0 %v406_v26  ;;  %v1600_v26 = vld [vmem:[%s2099_s2 + $0x20] sm:$0xff]  }
  0xe3   :  { %1504 = vmatpush3.bf16.msra.mxu0 %v1848_v30  ;;  %1416 = vmatprep.mubr.msk.f32.mxu0 %vm1711_vm2, %v1712_v46 }
  0xe4   :  { %1505 = vmatprep.subr.bf16.mxu0 %v1710_v29 }
  0xe7   :  { %1507 = vmatpush3.bf16.msra.mxu0 %v1851_v33 }
  0xe8   :  { %1508 = vmatprep.subr.bf16.mxu0 %v1710_v29 }
  0xeb   :  { %1510 = vmatpush3.bf16.msra.mxu0 %v1855_v37 }
  0xec   :  { %1511 = vmatprep.subr.bf16.mxu0 %v1710_v29 }
  0xef   :  { %1513 = vmatpush3.bf16.msra.mxu0 %v1919_v31 }
  0xf0   :  { %1514 = vmatprep.subr.bf16.mxu0 %v1710_v29 }
  0xf3   :  { %1516 = vmatpush3.bf16.msra.mxu0 %v1925_v35 }
  0xf4   :  { %1517 = vmatprep.subr.bf16.mxu0 %v1710_v29 }
  0xf7   :  { %1519 = vmatpush3.bf16.msra.mxu0 %v1931_v39 }
  0xf8   :  { %1520 = vmatprep.subr.bf16.mxu0 %v1710_v29 }
  0xfb   :  { %1522 = vmatpush3.bf16.msra.mxu0 %v1937_v42 }
  0xfc   :  { %1523 = vmatprep.subr.bf16.mxu0 %v1710_v29 }
  0xff   :  { %1525 = vmatpush3.bf16.msra.mxu0 %v1944_v47 }
 0x1b5   :  { %v1952_v50 = vpop.f32.mrb[0].mxu0 }
 0x1b6   :  { %v1954_v51 = vpop.f32.mrb[1].mxu0  ;;  %v538_v59 = vmul.f32 %v1952_v50, %v1952_v50 }
 0x1b7   :  { %v1956_v52 = vpop.f32.mrb[2].mxu0  ;;  %v536_v54 = vmul.f32 %v1954_v51, %v1954_v51 }
 0x1b8   :  { %v1958_v53 = vpop.f32.mrb[3].mxu0  ;;  %v539_v62 = vmul.f32 %v1956_v52, %v1956_v52 }
 0x1b9   :  { %v527_v55 = vadd.f32 %v1958_v53, %v1954_v51  ;;  %v537_v56 = vmul.f32 %v1958_v53, %v1958_v53 }
 0x1bb   :  { %v528_v60 = vadd.f32 %v1952_v50, %v527_v55  ;;  %v540_v61 = vadd.f32 %v537_v56, %v536_v54 }
 0x1bd   :  { %v529_v63 = vadd.f32 %v1956_v52, %v528_v60  ;;  %v541_v0 = vadd.f32 %v540_v61, %v538_v59  ;;  %v525_v59 = vld [vmem:[%s2100_s3] sm:$0x1]  ;;  %v2018_v60 = vsub.s32 0, %v1860_v43 }
 0x1bf   :  { %v530_v1 = vrot.slane %v529_v63, 4  ;;  %v542_v2 = vadd.f32 %v541_v0, %v539_v62 }
 0x1c1   :  { %v531_v5 = vadd.f32 %v530_v1, %v529_v63  ;;  %v543_v10 = vrot.slane %v542_v2, 4  ;;  %v526_v63 = vld [vmem:[%s2101_s4] sm:$0x1] }
 0x1c3   :  { %v532_v6 = vrot.slane %v531_v5, 2  ;;  %v544_v11 = vadd.f32 %v543_v10, %v542_v2 }
 0x1c5   :  { %v533_v7 = vadd.f32 %v532_v6, %v531_v5  ;;  %v545_v14 = vrot.slane %v544_v11, 2 }
 0x1c7   :  { %v534_v8 = vrot.slane %v533_v7, 1  ;;  %v546_v15 = vadd.f32 %v545_v14, %v544_v11 }
 0x1c9   :  { %v535_v9 = vadd.f32 %v534_v8, %v533_v7  ;;  %v547_v16 = vrot.slane %v546_v15, 1 }
 0x1cb   :  { %1327 = vmatmul.mubr.f32.vlgmr.msra.gmra.mrb[0].mxu1 %v535_v9  ;;  %v548_v17 = vadd.f32 %v547_v16, %v546_v15 }
 0x1cc   :  { %1480 = vmatpush3.bf16.msra.mxu1 %v1848_v30  ;;  %1361 = vmatprep.mubr.msk.f32.mxu1 %vm1711_vm2, %v1712_v46 }
 0x1cd   :  { %1481 = vmatprep.subr.bf16.mxu1 %v1710_v29 }
 0x1d0   :  { %1483 = vmatpush3.bf16.msra.mxu1 %v1851_v33 }
 0x1d1   :  { %1484 = vmatprep.subr.bf16.mxu1 %v1710_v29 }
 0x1d4   :  { %1486 = vmatpush3.bf16.msra.mxu1 %v1855_v37 }
 0x1d5   :  { %1487 = vmatprep.subr.bf16.mxu1 %v1710_v29 }
 0x1d8   :  { %1489 = vmatpush3.bf16.msra.mxu1 %v1919_v31 }
 0x1d9   :  { %1490 = vmatprep.subr.bf16.mxu1 %v1710_v29 }
 0x1dc   :  { %1492 = vmatpush3.bf16.msra.mxu1 %v1925_v35 }
 0x1dd   :  { %1493 = vmatprep.subr.bf16.mxu1 %v1710_v29 }
 0x1e0   :  { %1495 = vmatpush3.bf16.msra.mxu1 %v1931_v39 }
 0x1e1   :  { %1496 = vmatprep.subr.bf16.mxu1 %v1710_v29 }
 0x1e4   :  { %1498 = vmatpush3.bf16.msra.mxu1 %v1937_v42 }
 0x1e5   :  { %1499 = vmatprep.subr.bf16.mxu1 %v1710_v29 }
 0x1e8   :  { %1501 = vmatpush3.bf16.msra.mxu1 %v1944_v47 }
 0x1e9   :  { %1364 = vmatprep.subr.bf16.mxu1 %v1596_v19 }
 0x1eb   :  { %1362 = vmatmul.mubr.f32.vlgmr.msra.gmra.mrb[2].mxu1 %v548_v17 }
 0x1ec   :  { %1365 = vmatpush3.bf16.msra.mxu1 %v1596_v19 }
 0x1ed   :  { %1366 = vmatprep.subr.bf16.mxu1 %v1597_v23 }
 0x1f0   :  { %1367 = vmatpush3.bf16.msra.mxu1 %v1597_v23 }
 0x1f1   :  { %1368 = vmatprep.subr.bf16.mxu1 %v1598_v24 }
 0x1f4   :  { %1369 = vmatpush3.bf16.msra.mxu1 %v1598_v24 }
 0x1f5   :  { %1370 = vmatprep.subr.bf16.mxu1 %v1599_v25 }
 0x1f8   :  { %1371 = vmatpush3.bf16.msra.mxu1 %v1599_v25 }
 0x1f9   :  { %1372 = vmatprep.subr.bf16.mxu1 %v1600_v26 }
 0x1fc   :  { %1373 = vmatpush3.bf16.msra.mxu1 %v1600_v26 }
 0x1fd   :  { %1374 = vmatprep.subr.bf16.mxu1 %v1601_v27 }
 0x200   :  { %1375 = vmatpush3.bf16.msra.mxu1 %v1601_v27 }
 0x201   :  { %1376 = vmatprep.subr.bf16.mxu1 %v1602_v28 }
 0x204   :  { %1377 = vmatpush3.bf16.msra.mxu1 %v1602_v28 }
 0x205   :  { %1378 = vmatprep.subr.bf16.mxu1 %v1603_v32 }
 0x208   :  { %1379 = vmatpush3.bf16.msra.mxu1 %v1603_v32 }
 0x209   :  { %1526 = vmatprep.subr.bf16.mxu1 %v1710_v29 }
 0x29e   :  { %v615_v34 = vpop.f32.mrb[0].mxu1 }
 0x29f   :  { %v1328_v36 = vpop.f32.mrb[1].mxu1  ;;  %v619_v38 = vmul.f32 0.001953125, %v615_v34 }
 0x2a1   :  { %v691_v41 = vmul.f32 %v619_v38, %v619_v38 }
 0x2be   :  { %v686_v40 = vpop.f32.mrb[2].mxu1 }
 0x2bf   :  { %v690_v44 = vmul.f32 0.001953125, %v686_v40  ;;  %v1363_v45 = vpop.f32.mrb[3].mxu1 }
 0x2c1   :  { %v692_v54 = vsub.f32 %v690_v44, %v691_v41 }
 0x2c3   :  { %v693_v55 = vmax.f32 %v692_v54, 0.0 }
 0x2c5   :  { %v694_v56 = vadd.f32 1e-05, %v693_v55 }
 0x2c7   :  { %1604 = vrsqrt.f32 %v694_v56 }
 0x2d1   :  { %v1605_v61 = vpop.eup %1604 }
 0x2d2   :  { %v696_v62 = vmul.f32 %v1605_v61, %v525_v59 }
 0x2d4   :  { %v697_v0 = vmul.f32 %v696_v62, %v619_v38  ;;  %v703_v1 = vrot.slane %v696_v62, %v2018_v60 }
 0x2d6   :  { %v698_v2 = vsub.f32 %v526_v63, %v697_v0  ;;  %v705_v5 = vmul.f32 %v703_v1, %v1954_v51  ;;  %v706_v6 = vmul.f32 %v703_v1, %v1958_v53  ;;  %v707_v7 = vmul.f32 %v1952_v50, %v703_v1 }
 0x2d7   :  { %v708_v8 = vmul.f32 %v1956_v52, %v703_v1 }
 0x2d8   :  { %v713_v9 = vrot.slane %v698_v2, %v2018_v60 }
 0x2da   :  { %v715_v10 = vadd.f32 %v713_v9, %v705_v5  ;;  %v716_v11 = vadd.f32 %v713_v9, %v706_v6  ;;  %v717_v14 = vadd.f32 %v713_v9, %v707_v7  ;;  %v718_v15 = vadd.f32 %v713_v9, %v708_v8 }
 0x2dc   :  { %v719_v16 = vmax.f32 %v715_v10, 0.0  ;;  %v720_v17 = vmax.f32 %v716_v11, 0.0  ;;  %v721_v19 = vmax.f32 %v717_v14, 0.0  ;;  %v722_v23 = vmax.f32 %v718_v15, 0.0 }
 0x2de   :  { %v723_v24 = vrot.slane %v719_v16, 7  ;;  %v724_v25 = vrot.slane %v720_v17, 7  ;;  %v726_v26 = vrot.slane %v722_v23, 7  ;;  %v735_v51 = vrot.slane %v719_v16, 1 }
 0x2df   :  { %v736_v27 = vrot.slane %v720_v17, 1  ;;  %v737_v53 = vrot.slane %v721_v19, 1  ;;  %v725_v28 = vrot.slane %v721_v19, 7  ;;  %v738_v32 = vrot.slane %v722_v23, 1 }
 0x2e0   :  { %v729_v50 = vsel %vm112_vm0, %v723_v24, %v724_v25  ;;  %v730_v52 = vsel %vm112_vm0, %v726_v26, %v723_v24 }
 0x2e1   :  { %v731_v34 = vmul.f32 %v730_v52, %v1869_v49  ;;  %v732_v36 = vmul.f32 %v729_v50, %v1885_v58  ;;  %v740_v38 = vsel %vm145_vm1, %v736_v27, %v737_v53  ;;  %v741_v40 = vsel %vm145_vm1, %v735_v51, %v736_v27 }
 0x2e2   :  { %v743_v41 = vmul.f32 %v741_v40, %v1897_v4  ;;  %v744_v44 = vmul.f32 %v740_v38, %v1895_v3  ;;  %v727_v45 = vsel %vm112_vm0, %v725_v28, %v726_v26  ;;  %v728_v54 = vsel %vm112_vm0, %v724_v25, %v725_v28 }
 0x2e3   :  { %v747_v55 = vadd.f32 %v731_v34, %v719_v16  ;;  %v748_v49 = vadd.f32 %v732_v36, %v720_v17  ;;  %v733_v58 = vmul.f32 %v728_v54, %v1867_v48  ;;  %v734_v56 = vmul.f32 %v727_v45, %v1883_v57  ;;  %v870_v36 = vld [vmem:[%s2102_s5] sm:$0x1]  ;;  %s1713_s5 = smov [#allocation8]  }
 0x2e4   :  { %v739_v59 = vsel %vm145_vm1, %v737_v53, %v738_v32  ;;  %v742_v4 = vsel %vm145_vm1, %v738_v32, %v735_v51  ;;  %s1081_s24 = sshll.u32 %s1713_s5, 4  ;;  %s1082_s24 = int_to_ptr.vmem [resolvable:$true] %s1081_s24 }
 0x2e5   :  { %v751_v61 = vadd.f32 %v747_v55, %v743_v41  ;;  %v752_v3 = vadd.f32 %v748_v49, %v744_v44  ;;  %v745_v62 = vmul.f32 %v739_v59, %v1906_v21  ;;  %v746_v63 = vmul.f32 %v742_v4, %v1902_v18  ;;  %v871_v41 = vld [vmem:[%s2103_s6] sm:$0x1]  ;;  %s1674_s6 = scalar_lea.vmem %s1082_s24, 512  ;;  %p1679_p11 = scmp.lt.s32.totalorder %s1082_s24, %s1082_s24 }
 0x2e6   :  { %v749_v0 = vadd.f32 %v733_v58, %v721_v19  ;;  %v750_v1 = vadd.f32 %v734_v56, %v722_v23  ;;  %p1675_p10 = scmp.ne.s32.totalorder %s1082_s24, %s1674_s6  ;;  %p1680_p12 = scmp.lt.s32.totalorder %s1674_s6, %s1674_s6 }
 0x2e7   :  { %v755_v2 = vpack.c.bf16 %v752_v3, %v751_v61 }
 0x2e8   :  { %v753_v5 = vadd.f32 %v749_v0, %v745_v62  ;;  %v754_v6 = vadd.f32 %v750_v1, %v746_v63  ;;  %p1681_p13 = por %p1680_p12, %p1679_p11 }
 0x2e9   :  { %1380 = vmatprep.mubr.bf16.mxu1 %v755_v2 }
 0x2ea   :  { %v756_v48 = vpack.c.bf16 %v754_v6, %v753_v5  ;;  %p1682_p0 = pnand %p1681_p13, %p1675_p10 }
 0x2ec   :  { %1381 = vmatmul.mubr.bf16.vlgmr.msra.gmra.mrb[4].mxu1 %v756_v48 }
 0x2ed   :  { %1528 = vmatpush3.bf16.msra.mxu1 %v1848_v30  ;;  %1451 = vmatprep.mubr.msk.f32.mxu1 %vm1711_vm2, %v1712_v46 }
 0x2ee   :  { %1529 = vmatprep.subr.bf16.mxu1 %v1710_v29 }
 0x2f1   :  { %1531 = vmatpush3.bf16.msra.mxu1 %v1851_v33 }
 0x2f2   :  { %1532 = vmatprep.subr.bf16.mxu1 %v1710_v29 }
 0x2f5   :  { %1534 = vmatpush3.bf16.msra.mxu1 %v1855_v37 }
 0x2f6   :  { %1535 = vmatprep.subr.bf16.mxu1 %v1710_v29 }
 0x2f9   :  { %1537 = vmatpush3.bf16.msra.mxu1 %v1919_v31 }
 0x2fa   :  { %1538 = vmatprep.subr.bf16.mxu1 %v1710_v29 }
 0x2fd   :  { %1540 = vmatpush3.bf16.msra.mxu1 %v1925_v35 }
 0x2fe   :  { %1541 = vmatprep.subr.bf16.mxu1 %v1710_v29 }
 0x301   :  { %1543 = vmatpush3.bf16.msra.mxu1 %v1931_v39 }
 0x302   :  { %1544 = vmatprep.subr.bf16.mxu1 %v1710_v29 }
 0x305   :  { %1546 = vmatpush3.bf16.msra.mxu1 %v1937_v42 }
 0x306   :  { %1547 = vmatprep.subr.bf16.mxu1 %v1710_v29 }
 0x309   :  { %1549 = vmatpush3.bf16.msra.mxu1 %v1944_v47 }
 0x3bf   :  { %v1382_v30 = vpop.f32.mrb[4].mxu1 }
 0x3c0   :  { %v855_v33 = vpop.f32.mrb[5].mxu1  ;;  %v883_v31 = vmul.f32 %v1382_v30, %v1382_v30 }
 0x3c1   :  { %v1383_v37 = vpop.f32.mrb[6].mxu1  ;;  %v881_v57 = vmul.f32 %v855_v33, %v855_v33 }
 0x3c2   :  { %v858_v43 = vpop.f32.mrb[7].mxu1  ;;  %v884_v7 = vmul.f32 %v1383_v37, %v1383_v37 }
 0x3c3   :  { %v872_v18 = vadd.f32 %v858_v43, %v855_v33  ;;  %v882_v21 = vmul.f32 %v858_v43, %v858_v43 }
 0x3c5   :  { %v873_v35 = vadd.f32 %v1382_v30, %v872_v18  ;;  %v885_v46 = vadd.f32 %v882_v21, %v881_v57 }
 0x3c7   :  { %v874_v39 = vadd.f32 %v1383_v37, %v873_v35  ;;  %v886_v8 = vadd.f32 %v885_v46, %v883_v31 }
 0x3c9   :  { %v875_v9 = vrot.slane %v874_v39, 4  ;;  %v887_v10 = vadd.f32 %v886_v8, %v884_v7 }
 0x3cb   :  { %v876_v42 = vadd.f32 %v875_v9, %v874_v39  ;;  %v888_v11 = vrot.slane %v887_v10, 4 }
 0x3cd   :  { %v877_v29 = vrot.slane %v876_v42, 2  ;;  %v889_v14 = vadd.f32 %v888_v11, %v887_v10 }
 0x3cf   :  { %v878_v47 = vadd.f32 %v877_v29, %v876_v42  ;;  %v890_v15 = vrot.slane %v889_v14, 2 }
 0x3d1   :  { %v879_v16 = vrot.slane %v878_v47, 1  ;;  %v891_v17 = vadd.f32 %v890_v15, %v889_v14 }
 0x3d3   :  { %v880_v19 = vadd.f32 %v879_v16, %v878_v47  ;;  %v892_v23 = vrot.slane %v891_v17, 1 }
 0x3d5   :  { %1417 = vmatmul.mubr.f32.vlgmr.msra.gmra.mrb[4].mxu0 %v880_v19  ;;  %v893_v24 = vadd.f32 %v892_v23, %v891_v17 }
 0x3d7   :  { %1452 = vmatmul.mubr.f32.vlgmr.msra.gmra.mrb[8].mxu1 %v893_v24 }
 0x4a8   :  { %v960_v25 = vpop.f32.mrb[4].mxu0 }
 0x4a9   :  { %v964_v26 = vmul.f32 0.001953125, %v960_v25  ;;  %v1418_v51 = vpop.f32.mrb[5].mxu0 }
 0x4aa   :  { %v1031_v27 = vpop.f32.mrb[8].mxu1 }
 0x4ab   :  { %v1036_v53 = vmul.f32 %v964_v26, %v964_v26  ;;  %v1035_v28 = vmul.f32 0.001953125, %v1031_v27  ;;  %v1453_v50 = vpop.f32.mrb[9].mxu1 }
 0x4ad   :  { %v1037_v52 = vsub.f32 %v1035_v28, %v1036_v53 }
 0x4af   :  { %v1038_v32 = vmax.f32 %v1037_v52, 0.0 }
 0x4b1   :  { %v1039_v34 = vadd.f32 1e-05, %v1038_v32 }
 0x4b3   :  { %1606 = vrsqrt.f32 %v1039_v34 }
 0x4bd   :  { %v1607_v38 = vpop.eup %1606 }
 0x4be   :  { %v1041_v40 = vmul.f32 %v1607_v38, %v870_v36 }
 0x4c0   :  { %v1042_v44 = vmul.f32 %v1041_v40, %v964_v26  ;;  %v1048_v45 = vrot.slane %v1041_v40, %v2018_v60 }
 0x4c2   :  { %v1043_v54 = vsub.f32 %v871_v41, %v1042_v44  ;;  %v1050_v55 = vmul.f32 %v1048_v45, %v855_v33  ;;  %v1051_v49 = vmul.f32 %v1048_v45, %v858_v43  ;;  %v1052_v58 = vmul.f32 %v1382_v30, %v1048_v45 }
 0x4c3   :  { %v1053_v56 = vmul.f32 %v1383_v37, %v1048_v45 }
 0x4c4   :  { %v1058_v59 = vrot.slane %v1043_v54, %v2018_v60 }
 0x4c6   :  { %v1060_v4 = vadd.f32 %v1058_v59, %v1050_v55  ;;  %v1061_v61 = vadd.f32 %v1058_v59, %v1051_v49  ;;  %v1062_v3 = vadd.f32 %v1058_v59, %v1052_v58  ;;  %v1063_v62 = vadd.f32 %v1058_v59, %v1053_v56 }
 0x4c8   :  { %v1064_v63 = vadd.f32 %v1060_v4, %v1835_v12  ;;  %v1065_v0 = vadd.f32 %v1061_v61, %v1837_v13  ;;  %v1066_v1 = vadd.f32 %v1062_v3, %v1841_v20  ;;  %v1067_v2 = vadd.f32 %v1063_v62, %v1843_v22 }
 0x4ca   :  { %v1068_v5 = vmax.f32 %v1064_v63, 0.0  ;;  %v1069_v6 = vmax.f32 %v1065_v0, 0.0  ;;  %v1070_v48 = vmax.f32 %v1066_v1, 0.0  ;;  %v1071_v30 = vmax.f32 %v1067_v2, 0.0 }
 0x4cc   :  { %1072 = vst [vmem:[#allocation8] sm:$0xff] %v1068_v5  ;;  %1073 = vst [vmem:[#allocation8 + $0x8] sm:$0xff] %v1069_v6 }
 0x4cd   :  { %1074 = vst [vmem:[#allocation8 + $0x10] sm:$0xff] %v1070_v48  ;;  %1075 = vst [vmem:[#allocation8 + $0x18] sm:$0xff] %v1071_v30 }
 0x4ce   :  { %1685 = shalt.err (!%p1682_p0)
}
 0x4cf   :  { %s1686_s26 = scalar_lea.hbm %s2107_s10, 512 }
 0x4d0   :  { %p1687_p1 = scmp.ne.s32.totalorder %s2107_s10, %s1686_s26  ;;  %p1690_p2 = scmp.lt.u32.totalorder %s1686_s26, %s2107_s10 }
 0x4d2   :  { %p1692_p3 = pnand %p1690_p2, %p1687_p1 }
 0x4d4   :  { %1695 = shalt.err (!%p1692_p3)
}
 0x4d5   :  { %1087 = dma.vmem_to_hbm [thread:$0]  %s1082_s24, 512, %s2107_s10, [#allocation4], %s1706_s1, %s1706_s1, %s1707_s14  }
 0x4d6   :  { %1700 = dma.done.wait [#allocation4], 512  }
 0x4d7   :  { %1701 = vsyncadd [#allocation4], 4294966784 }
 0x4d8   :  { %1091 = vsyncpa [#allocation3], 1 }
 0x4d9   :  { %1092 = vsyncpa [#allocation6], 1 }
 0x4da   :  { %1093 = vsyncpa [#allocation4], 1 }

</bundles_post_ra>
